<compile_context>
chip_gen: v7x
topology: tpu7x:2x2x1
jax: 0.10.0
libtpu: 0.0.40
codegen_flags: <defaults>
</compile_context>

<pallas_src>
import math
import functools

import numpy as np
import jax
import jax.numpy as jnp
from jax.experimental import pallas as pl
from jax.experimental.pallas import tpu as pltpu


# bf16 MXU operands (accumulate f32): required on v5e (no f32 MXU path), halves weight /
# activation VMEM traffic on v6e/v7x.
MXU_DTYPE = jnp.bfloat16


# ----------------------------------------------------------------------------
# Fused Pallas kernel: emb_out + all proposal branches, one block of B_BLK
# batch elements per grid step.
# ----------------------------------------------------------------------------

def _fused_prop_kernel(x_ref, w1_ref, c3_ref, w2_ref, c4_ref, o_ref, vf_ref, *,
                       k_max, L_max):
    """
    x_ref  : (B_BLK, T, D)          input features (f32)
    w1_ref : (k_max, D, n_k*D)      tap-folded pw1 weights (dropout/BN1/BN2/BN3 folded), bf16
    c3_ref : (1, n_k*D)             per-channel bias after pw1/BN3 (f32)
    w2_ref : (4*n_k, n_k*D)         block-diagonal pw2 weights (BN4 scale folded), bf16
    c4_ref : (4*n_k, 1)             pw2 bias + BN4 shift (f32)
    o_ref  : (4*n_k, B_BLK*L_max)   dense per-block prediction slab
    vf_ref : (B_BLK, T+k_max-1, D)  f32 scratch: relu(x) with zero tail for the taps
    """
    B_BLK, T, D = x_ref.shape
    rows = B_BLK * L_max
    mxu = w1_ref.dtype

    # emb_out (eval): relu(x * keep) == keep * relu(x); keep folded into w1 taps.
    # TODO(synk): vis_emb Transformer encoder source not provided; identity used.
    vf_ref[:, 0:T, :] = jnp.maximum(x_ref[...], 0.0)
    if k_max > 1:                     # zero tail so every branch can emit L_max rows
        vf_ref[:, T:, :] = jnp.zeros((B_BLK, k_max - 1, D), jnp.float32)

    # Depthwise conv + all BN folding on the MXU: U = sum_j shift_j(relu(x)) @ W1taps[j] + c3.
    # LHS is (B_BLK*L_max, D) tall; output lanes = n_k*D (branch blocks on the lane axis).
    u = None
    for j in range(k_max):            # static unroll, k_max is small
        vj = vf_ref[:, j:j + L_max, :].reshape(rows, D).astype(mxu)
        pj = jnp.dot(vj, w1_ref[j], preferred_element_type=jnp.float32)
        u = pj if u is None else u + pj
    u = u + c3_ref[...]
    r = jnp.maximum(u, 0.0).astype(mxu)                                   # (rows, n_k*D)

    # Final 1x1 conv for all branches, produced directly in transposed orientation
    # (contract r's channel dim) -> (4*n_k, rows); no XLU transpose, single dense store.
    zt = jax.lax.dot_general(
        w2_ref[...], r,
        dimension_numbers=(((1,), (1,)), ((), ())),
        preferred_element_type=jnp.float32) + c4_ref[...]
    o_ref[...] = zt.astype(o_ref.dtype)


def fused_prop_pallas(x, fp, *, block_b=None):
    """x: (B, T, D) float32.  Returns prop_all: (B, 6, sum L_i) float32."""
    B, T, D = x.shape
    branch_info = fp["branch_info"]
    n_k, k_max, L_max, L_total = fp["n_k"], fp["k_max"], fp["L_max"], fp["L_total"]

    # Batch-block so each grid step feeds the MXU B_BLK*L_max rows; keep grid >= 2 when
    # B >= 2 so v7x's two TensorCores both get work.
    if block_b is None:
        block_b = max(1, min(8, -(-B // 2)))
    b_blk = max(1, min(block_b, B))
    grid_b = -(-B // b_blk)
    B_pad = grid_b * b_blk
    if B_pad != B:
        x = jnp.concatenate([x, jnp.zeros((B_pad - B, T, D), x.dtype)], axis=0)

    rows_blk = b_blk * L_max
    kern = functools.partial(_fused_prop_kernel, k_max=k_max, L_max=L_max)

    params = [fp["w1taps"], fp["c3"], fp["w2tp"], fp["c4"]]
    in_specs = [pl.BlockSpec((b_blk, T, D), lambda g: (g, 0, 0))]
    for arr in params:
        # Constant block index -> fetched once, stays resident across the grid.
        # TODO(synk): add pipeline_mode=pl.Buffered(1) for these weight specs when re-budgeting
        #             resident VMEM for production D/T on v7x (64 MiB/TC).
        in_specs.append(pl.BlockSpec(arr.shape, lambda g, _n=arr.ndim: (0,) * _n))

    z = pl.pallas_call(
        kern,
        out_shape=jax.ShapeDtypeStruct((grid_b, 4 * n_k, rows_blk), jnp.float32),
        grid=(grid_b,),
        in_specs=in_specs,
        out_specs=pl.BlockSpec((None, 4 * n_k, rows_blk), lambda g: (g, 0, 0)),
        scratch_shapes=[pltpu.VMEM((b_blk, T + k_max - 1, D), jnp.float32)],
        compiler_params=pltpu.CompilerParams(
            dimension_semantics=("parallel",),
            vmem_limit_bytes=32 * 1024 * 1024),
    )(x, *params)

    # Cheap XLA glue on a KB-sized slab: unpack into (B, 4, L_total) and append the
    # data-independent anchor rows (precomputed host-side) with a single broadcast.
    z = z.reshape(grid_b, 4 * n_k, b_blk, L_max)
    z = jnp.transpose(z, (0, 2, 1, 3)).reshape(B_pad, 4 * n_k, L_max)[:B]
    pred = jnp.concatenate(
        [z[:, 4 * i:4 * i + 4, :L] for i, (k, s, L, off) in enumerate(branch_info)], axis=2)
    anchors = jnp.broadcast_to(fp["anchors"][None], (B, 2, L_total))
    return jnp.concatenate([pred, anchors], axis=1)


# ----------------------------------------------------------------------------
# Deterministic parameter initialization (synthetic, shapes from __init__)
# ----------------------------------------------------------------------------

def _init_bn_folded(key, d):
    k1, k2, k3, k4 = jax.random.split(key, 4)
    gamma = 1.0 + 0.1 * jax.random.normal(k1, (d,), jnp.float32)
    beta = 0.1 * jax.random.normal(k2, (d,), jnp.float32)
    running_mean = 0.1 * jax.random.normal(k3, (d,), jnp.float32)
    running_var = jax.random.uniform(k4, (d,), jnp.float32, minval=0.5, maxval=1.5)
    scale = gamma / jnp.sqrt(running_var + 1e-5)
    shift = beta - running_mean * scale
    return scale.reshape(d, 1), shift.reshape(d, 1)


def init_prop_branch(key, d_model, ksize):
    ks = jax.random.split(key, 8)
    bn1_s, bn1_b = _init_bn_folded(ks[0], d_model)
    w_dw = 0.1 * jax.random.normal(ks[1], (d_model, ksize), jnp.float32)     # Conv1d(D,D,k,groups=D)
    bn2_s, bn2_b = _init_bn_folded(ks[2], d_model)
    w_pw1 = 0.1 * jax.random.normal(ks[3], (d_model, d_model), jnp.float32)  # Conv1d(D,D,1)
    bn3_s, bn3_b = _init_bn_folded(ks[4], d_model)
    bn4_s, bn4_b = _init_bn_folded(ks[5], d_model)
    w_pw2 = 0.1 * jax.random.normal(ks[6], (4, d_model), jnp.float32)        # Conv1d(D,4,1)
    b_pw2 = 0.1 * jax.random.normal(ks[7], (4, 1), jnp.float32)
    return dict(bn1_s=bn1_s, bn1_b=bn1_b, w_dw=w_dw, bn2_s=bn2_s, bn2_b=bn2_b,
                w_pw1=w_pw1, bn3_s=bn3_s, bn3_b=bn3_b, bn4_s=bn4_s, bn4_b=bn4_b,
                w_pw2=w_pw2, b_pw2=b_pw2)


def init_params(key, d_model, kernel_list):
    keys = jax.random.split(key, len(kernel_list))
    return {"prop": [init_prop_branch(keys[i], d_model, k)
                     for i, k in enumerate(kernel_list)]}


# ----------------------------------------------------------------------------
# Host-side folding: dropout keep + all BatchNorms -> 4 packed arrays + anchors
# ----------------------------------------------------------------------------

def prepare_fused_params(params, kernel_list, stride_factor, T, D, keep,
                         weight_dtype=MXU_DTYPE):
    branch_info = []
    for i, k in enumerate(kernel_list):
        if k > T:
            print("skipping kernel sizes greater than {}".format(k))
            break
        stride = math.ceil(k / stride_factor)
        # TODO(synk): strided depthwise conv (kernel_size > stride_factor) not implemented.
        assert stride == 1, "only stride-1 depthwise conv supported in this kernel"
        L = (T - k) // stride + 1
        anchor_len = np.arange(float(k) / 2.0, float(T + 1 - k / 2.0), stride).shape[0]
        if anchor_len != L:
            raise Exception("size mismatch!")
        off = sum(b[2] for b in branch_info)
        branch_info.append((k, stride, L, off))

    n_k = len(branch_info)
    k_max = max(b[0] for b in branch_info)
    L_max = max(b[2] for b in branch_info)
    L_total = sum(b[2] for b in branch_info)

    w1taps = np.zeros((k_max, D, n_k * D), np.float32)
    c3 = np.zeros((1, n_k * D), np.float32)
    w2tp = np.zeros((4 * n_k, n_k * D), np.float32)
    c4 = np.zeros((4 * n_k, 1), np.float32)
    anchors = np.zeros((2, L_total), np.float32)

    for i, (k, s, L, off) in enumerate(branch_info):
        p = {n: np.asarray(v) for n, v in params["prop"][i].items()}
        s1, b1 = p["bn1_s"][:, 0], p["bn1_b"][:, 0]
        s2, b2 = p["bn2_s"][:, 0], p["bn2_b"][:, 0]
        s3, b3 = p["bn3_s"][:, 0], p["bn3_b"][:, 0]
        s4, b4 = p["bn4_s"][:, 0], p["bn4_b"][:, 0]
        w_dw, W1, W2, bW2 = p["w_dw"], p["w_pw1"], p["w_pw2"], p["b_pw2"][:, 0]

        # fold depthwise taps + dropout keep + BN1/BN2 scales + BN3*pw1 into per-tap matmuls
        W1f = s3[:, None] * W1                                   # (D_out=c, D_in=d)
        dwscale = keep * s1 * s2                                 # (D,)
        for j in range(k):
            w1taps[j, :, i * D:(i + 1) * D] = (dwscale * w_dw[:, j])[:, None] * W1f.T
        beta = s2 * b1 * w_dw.sum(axis=1) + b2                   # constant part after BN2
        c3[0, i * D:(i + 1) * D] = W1f @ beta + b3               # bias after pw1/BN3

        W2f = W2 * s4[None, :]                                   # BN4 scale folded into pw2
        w2tp[4 * i:4 * i + 4, i * D:(i + 1) * D] = W2f
        c4[4 * i:4 * i + 4, 0] = W2 @ b4 + bW2                   # BN4 shift + conv bias

        # data-independent anchor rows (length, center) precomputed host-side
        anchors[0, off:off + L] = float(k)
        anchors[1, off:off + L] = np.arange(L, dtype=np.float32) * s + float(k) / 2.0

    return dict(w1taps=jnp.asarray(w1taps, dtype=weight_dtype),
                c3=jnp.asarray(c3),
                w2tp=jnp.asarray(w2tp, dtype=weight_dtype),
                c4=jnp.asarray(c4),
                anchors=jnp.asarray(anchors),
                branch_info=tuple(branch_info),
                n_k=n_k, k_max=k_max, L_max=L_max, L_total=L_total)


# ----------------------------------------------------------------------------
# Forward pass (mirrors ActionPropDenseCap.forward, eval semantics)
# ----------------------------------------------------------------------------

def action_prop_dense_cap_forward(x, fused_params, *, nsamples, block_b=None):
    B, T, _ = x.shape

    # emb_out + (identity) vis_emb + all prop_out branches (+ anchors appended): fused kernel.
    prop_all = fused_prop_pallas(x, fused_params, block_b=block_b)   # (B, 6, sum L_i)

    sample_each = nsamples // 2
    pred_score = jnp.zeros((sample_each * B, 2), jnp.float32)
    gt_score = jnp.zeros((sample_each * B, 2), jnp.float32)

    # TODO(synk): cap_model (RealTransformer) source not provided; captioning outputs omitted.
    pred_sentence = None
    gt_cent = None
    scst_loss = None
    mask_loss = None
    return pred_score, gt_score, pred_sentence, gt_cent, scst_loss, mask_loss, prop_all


# ----------------------------------------------------------------------------
# NumPy reference (un-folded weights) for correctness check of the Pallas path
# ----------------------------------------------------------------------------

def _np_ref_prop_all(x, params, kernel_list, stride_factor, p_drop):
    xe = np.maximum(np.asarray(x) * (1.0 - p_drop), 0.0)
    vf = np.transpose(xe, (0, 2, 1))                    # (B, D, T)
    B, D, T = vf.shape
    props = []
    for i, k in enumerate(kernel_list):
        p = {n: np.asarray(v) for n, v in params["prop"][i].items()}
        s = math.ceil(k / stride_factor)
        L = (T - k) // s + 1
        h = vf * p["bn1_s"][None] + p["bn1_b"][None]
        acc = np.zeros((B, D, L), np.float32)
        for j in range(k):
            acc += p["w_dw"][None, :, j:j + 1] * h[:, :, j:j + L]
        h = acc * p["bn2_s"][None] + p["bn2_b"][None]
        h = np.einsum("cd,bdl->bcl", p["w_pw1"], h)
        h = h * p["bn3_s"][None] + p["bn3_b"][None]
        h = np.maximum(h, 0.0)
        h = h * p["bn4_s"][None] + p["bn4_b"][None]
        z = np.einsum("cd,bdl->bcl", p["w_pw2"], h) + p["b_pw2"][None]
        anchor_c = np.arange(float(k) / 2.0, float(T + 1 - k / 2.0),
                             math.ceil(k / stride_factor)).astype(np.float32)
        ac = np.broadcast_to(anchor_c[None, None, :], (B, 1, L))
        al = np.full((B, 1, L), float(k), np.float32)
        props.append(np.concatenate([z, al, ac], axis=1))
    return np.concatenate(props, axis=2)


# ----------------------------------------------------------------------------
# Main
# ----------------------------------------------------------------------------

if __name__ == "__main__":
    B, T, d_model = 4, 16, 32
    kernel_list = [1, 3, 5, 7]
    stride_factor = 10
    in_emb_dropout = 0.1
    nsamples = 20

    key = jax.random.PRNGKey(0)
    kx, kp = jax.random.split(key)
    x = jax.random.normal(kx, (B, T, d_model), jnp.float32)
    params = init_params(kp, d_model, kernel_list)
    fused = prepare_fused_params(params, kernel_list, stride_factor, T, d_model,
                                 keep=1.0 - in_emb_dropout, weight_dtype=MXU_DTYPE)

    # B=4 with auto block_b -> B_BLK=2, grid=(2,): batched MXU rows AND >=2 grid steps.
    outs = action_prop_dense_cap_forward(x, fused, nsamples=nsamples)
    pred_score, gt_score, pred_sentence, gt_cent, scst_loss, mask_loss, prop_all = outs
    jax.block_until_ready(prop_all)
    jax.block_until_ready(pred_score)

    ref = _np_ref_prop_all(x, params, kernel_list, stride_factor, in_emb_dropout)
    assert prop_all.shape == ref.shape == (B, 6, sum(T - k + 1 for k in kernel_list))
    # bf16 MXU operands (f32 accumulation) -> loosened tolerance vs the f32 NumPy reference.
    np.testing.assert_allclose(np.asarray(prop_all), ref, rtol=2e-2, atol=1e-2)

    print("KERNEL_OK")
</pallas_src>

<mosaic_0001>
module attributes {stable_mosaic.version = 11 : i64} {
  func.func @_fused_prop_kernel(%arg0: i32, %arg1: memref<2x16x32xf32, #tpu.memory_space<vmem>>, %arg2: memref<7x32x128xbf16, #tpu.memory_space<vmem>>, %arg3: memref<1x128xf32, #tpu.memory_space<vmem>>, %arg4: memref<16x128xbf16, #tpu.memory_space<vmem>>, %arg5: memref<16x1xf32, #tpu.memory_space<vmem>>, %arg6: memref<1x16x32xf32, #tpu.memory_space<vmem>>, %arg7: memref<2x22x32xf32, #tpu.memory_space<vmem>>) attributes {dimension_semantics = [#tpu.dimension_semantics<parallel>], iteration_bounds = array<i64: 2>, scalar_prefetch = 0 : i64, scratch_operands = 1 : i64, tpu.core_type = #tpu.core_type<tc>, window_params = [{transform_indices = @transform_0, window_bounds = array<i64: 2, 16, 32>}, {pipeline_mode = #tpu.pipeline_mode<synchronous>, transform_indices = @transform_1, window_bounds = array<i64: 7, 32, 128>}, {pipeline_mode = #tpu.pipeline_mode<synchronous>, transform_indices = @transform_2, window_bounds = array<i64: 1, 128>}, {pipeline_mode = #tpu.pipeline_mode<synchronous>, transform_indices = @transform_3, window_bounds = array<i64: 16, 128>}, {pipeline_mode = #tpu.pipeline_mode<synchronous>, transform_indices = @transform_4, window_bounds = array<i64: 16, 1>}, {transform_indices = @transform_5, window_bounds = array<i64: 1, 16, 32>}]} {
    %c0 = arith.constant 0 : index
    %c0_0 = arith.constant 0 : index
    %c0_1 = arith.constant 0 : index
    %0 = vector.load %arg1[%c0, %c0_0, %c0_1] : memref<2x16x32xf32, #tpu.memory_space<vmem>>, vector<2x16x32xf32>
    %cst = arith.constant 0.000000e+00 : f32
    %1 = vector.broadcast %cst : f32 to vector<2x16x32xf32>
    %2 = arith.maximumf %0, %1 : vector<2x16x32xf32>
    %c0_2 = arith.constant 0 : index
    %c0_3 = arith.constant 0 : index
    %c0_4 = arith.constant 0 : index
    %3 = vector.load %arg7[%c0_2, %c0_3, %c0_4] : memref<2x22x32xf32, #tpu.memory_space<vmem>>, vector<2x16x32xf32>
    tpu.vector_store %arg7[%c0_2, %c0_3, %c0_4], %2 {strides = array<i32>} : memref<2x22x32xf32, #tpu.memory_space<vmem>>, vector<2x16x32xf32>,
    %cst_5 = arith.constant 0.000000e+00 : f32
    %4 = vector.broadcast %cst_5 : f32 to vector<2x6x32xf32>
    %c0_6 = arith.constant 0 : index
    %c16 = arith.constant 16 : index
    %c0_7 = arith.constant 0 : index
    %5 = vector.load %arg7[%c0_6, %c16, %c0_7] : memref<2x22x32xf32, #tpu.memory_space<vmem>>, vector<2x6x32xf32>
    tpu.vector_store %arg7[%c0_6, %c16, %c0_7], %4 {strides = array<i32>} : memref<2x22x32xf32, #tpu.memory_space<vmem>>, vector<2x6x32xf32>,
    %c0_8 = arith.constant 0 : index
    %c0_9 = arith.constant 0 : index
    %c0_10 = arith.constant 0 : index
    %6 = vector.load %arg7[%c0_8, %c0_9, %c0_10] : memref<2x22x32xf32, #tpu.memory_space<vmem>>, vector<2x16x32xf32>
    %7 = vector.shape_cast %6 : vector<2x16x32xf32> to vector<32x32xf32>
    %8 = arith.truncf %7 : vector<32x32xf32> to vector<32x32xbf16>
    %c0_11 = arith.constant 0 : index
    %c0_12 = arith.constant 0 : index
    %c0_13 = arith.constant 0 : index
    %9 = vector.load %arg2[%c0_11, %c0_12, %c0_13] : memref<7x32x128xbf16, #tpu.memory_space<vmem>>, vector<1x32x128xbf16>
    %10 = vector.shape_cast %9 : vector<1x32x128xbf16> to vector<32x128xbf16>
    %cst_14 = arith.constant dense<0.000000e+00> : vector<32x128xf32>
    %11 = tpu.matmul %8, %10, %cst_14 {dimension_numbers = #tpu.dot_dimension_numbers<[1], [0], [0], [1], [0, 0, 1, 1], [], []>} : vector<32x32xbf16>, vector<32x128xbf16>, vector<32x128xf32> -> vector<32x128xf32>
    %c0_15 = arith.constant 0 : index
    %c1 = arith.constant 1 : index
    %c0_16 = arith.constant 0 : index
    %12 = vector.load %arg7[%c0_15, %c1, %c0_16] : memref<2x22x32xf32, #tpu.memory_space<vmem>>, vector<2x16x32xf32>
    %13 = vector.shape_cast %12 : vector<2x16x32xf32> to vector<32x32xf32>
    %14 = arith.truncf %13 : vector<32x32xf32> to vector<32x32xbf16>
    %c1_17 = arith.constant 1 : index
    %c0_18 = arith.constant 0 : index
    %c0_19 = arith.constant 0 : index
    %15 = vector.load %arg2[%c1_17, %c0_18, %c0_19] : memref<7x32x128xbf16, #tpu.memory_space<vmem>>, vector<1x32x128xbf16>
    %16 = vector.shape_cast %15 : vector<1x32x128xbf16> to vector<32x128xbf16>
    %cst_20 = arith.constant dense<0.000000e+00> : vector<32x128xf32>
    %17 = tpu.matmul %14, %16, %cst_20 {dimension_numbers = #tpu.dot_dimension_numbers<[1], [0], [0], [1], [0, 0, 1, 1], [], []>} : vector<32x32xbf16>, vector<32x128xbf16>, vector<32x128xf32> -> vector<32x128xf32>
    %18 = arith.addf %11, %17 : vector<32x128xf32>
    %c0_21 = arith.constant 0 : index
    %c2 = arith.constant 2 : index
    %c0_22 = arith.constant 0 : index
    %19 = vector.load %arg7[%c0_21, %c2, %c0_22] : memref<2x22x32xf32, #tpu.memory_space<vmem>>, vector<2x16x32xf32>
    %20 = vector.shape_cast %19 : vector<2x16x32xf32> to vector<32x32xf32>
    %21 = arith.truncf %20 : vector<32x32xf32> to vector<32x32xbf16>
    %c2_23 = arith.constant 2 : index
    %c0_24 = arith.constant 0 : index
    %c0_25 = arith.constant 0 : index
    %22 = vector.load %arg2[%c2_23, %c0_24, %c0_25] : memref<7x32x128xbf16, #tpu.memory_space<vmem>>, vector<1x32x128xbf16>
    %23 = vector.shape_cast %22 : vector<1x32x128xbf16> to vector<32x128xbf16>
    %cst_26 = arith.constant dense<0.000000e+00> : vector<32x128xf32>
    %24 = tpu.matmul %21, %23, %cst_26 {dimension_numbers = #tpu.dot_dimension_numbers<[1], [0], [0], [1], [0, 0, 1, 1], [], []>} : vector<32x32xbf16>, vector<32x128xbf16>, vector<32x128xf32> -> vector<32x128xf32>
    %25 = arith.addf %18, %24 : vector<32x128xf32>
    %c0_27 = arith.constant 0 : index
    %c3 = arith.constant 3 : index
    %c0_28 = arith.constant 0 : index
    %26 = vector.load %arg7[%c0_27, %c3, %c0_28] : memref<2x22x32xf32, #tpu.memory_space<vmem>>, vector<2x16x32xf32>
    %27 = vector.shape_cast %26 : vector<2x16x32xf32> to vector<32x32xf32>
    %28 = arith.truncf %27 : vector<32x32xf32> to vector<32x32xbf16>
    %c3_29 = arith.constant 3 : index
    %c0_30 = arith.constant 0 : index
    %c0_31 = arith.constant 0 : index
    %29 = vector.load %arg2[%c3_29, %c0_30, %c0_31] : memref<7x32x128xbf16, #tpu.memory_space<vmem>>, vector<1x32x128xbf16>
    %30 = vector.shape_cast %29 : vector<1x32x128xbf16> to vector<32x128xbf16>
    %cst_32 = arith.constant dense<0.000000e+00> : vector<32x128xf32>
    %31 = tpu.matmul %28, %30, %cst_32 {dimension_numbers = #tpu.dot_dimension_numbers<[1], [0], [0], [1], [0, 0, 1, 1], [], []>} : vector<32x32xbf16>, vector<32x128xbf16>, vector<32x128xf32> -> vector<32x128xf32>
    %32 = arith.addf %25, %31 : vector<32x128xf32>
    %c0_33 = arith.constant 0 : index
    %c4 = arith.constant 4 : index
    %c0_34 = arith.constant 0 : index
    %33 = vector.load %arg7[%c0_33, %c4, %c0_34] : memref<2x22x32xf32, #tpu.memory_space<vmem>>, vector<2x16x32xf32>
    %34 = vector.shape_cast %33 : vector<2x16x32xf32> to vector<32x32xf32>
    %35 = arith.truncf %34 : vector<32x32xf32> to vector<32x32xbf16>
    %c4_35 = arith.constant 4 : index
    %c0_36 = arith.constant 0 : index
    %c0_37 = arith.constant 0 : index
    %36 = vector.load %arg2[%c4_35, %c0_36, %c0_37] : memref<7x32x128xbf16, #tpu.memory_space<vmem>>, vector<1x32x128xbf16>
    %37 = vector.shape_cast %36 : vector<1x32x128xbf16> to vector<32x128xbf16>
    %cst_38 = arith.constant dense<0.000000e+00> : vector<32x128xf32>
    %38 = tpu.matmul %35, %37, %cst_38 {dimension_numbers = #tpu.dot_dimension_numbers<[1], [0], [0], [1], [0, 0, 1, 1], [], []>} : vector<32x32xbf16>, vector<32x128xbf16>, vector<32x128xf32> -> vector<32x128xf32>
    %39 = arith.addf %32, %38 : vector<32x128xf32>
    %c0_39 = arith.constant 0 : index
    %c5 = arith.constant 5 : index
    %c0_40 = arith.constant 0 : index
    %40 = vector.load %arg7[%c0_39, %c5, %c0_40] : memref<2x22x32xf32, #tpu.memory_space<vmem>>, vector<2x16x32xf32>
    %41 = vector.shape_cast %40 : vector<2x16x32xf32> to vector<32x32xf32>
    %42 = arith.truncf %41 : vector<32x32xf32> to vector<32x32xbf16>
    %c5_41 = arith.constant 5 : index
    %c0_42 = arith.constant 0 : index
    %c0_43 = arith.constant 0 : index
    %43 = vector.load %arg2[%c5_41, %c0_42, %c0_43] : memref<7x32x128xbf16, #tpu.memory_space<vmem>>, vector<1x32x128xbf16>
    %44 = vector.shape_cast %43 : vector<1x32x128xbf16> to vector<32x128xbf16>
    %cst_44 = arith.constant dense<0.000000e+00> : vector<32x128xf32>
    %45 = tpu.matmul %42, %44, %cst_44 {dimension_numbers = #tpu.dot_dimension_numbers<[1], [0], [0], [1], [0, 0, 1, 1], [], []>} : vector<32x32xbf16>, vector<32x128xbf16>, vector<32x128xf32> -> vector<32x128xf32>
    %46 = arith.addf %39, %45 : vector<32x128xf32>
    %c0_45 = arith.constant 0 : index
    %c6 = arith.constant 6 : index
    %c0_46 = arith.constant 0 : index
    %47 = vector.load %arg7[%c0_45, %c6, %c0_46] : memref<2x22x32xf32, #tpu.memory_space<vmem>>, vector<2x16x32xf32>
    %48 = vector.shape_cast %47 : vector<2x16x32xf32> to vector<32x32xf32>
    %49 = arith.truncf %48 : vector<32x32xf32> to vector<32x32xbf16>
    %c6_47 = arith.constant 6 : index
    %c0_48 = arith.constant 0 : index
    %c0_49 = arith.constant 0 : index
    %50 = vector.load %arg2[%c6_47, %c0_48, %c0_49] : memref<7x32x128xbf16, #tpu.memory_space<vmem>>, vector<1x32x128xbf16>
    %51 = vector.shape_cast %50 : vector<1x32x128xbf16> to vector<32x128xbf16>
    %cst_50 = arith.constant dense<0.000000e+00> : vector<32x128xf32>
    %52 = tpu.matmul %49, %51, %cst_50 {dimension_numbers = #tpu.dot_dimension_numbers<[1], [0], [0], [1], [0, 0, 1, 1], [], []>} : vector<32x32xbf16>, vector<32x128xbf16>, vector<32x128xf32> -> vector<32x128xf32>
    %53 = arith.addf %46, %52 : vector<32x128xf32>
    %c0_51 = arith.constant 0 : index
    %c0_52 = arith.constant 0 : index
    %54 = vector.load %arg3[%c0_51, %c0_52] : memref<1x128xf32, #tpu.memory_space<vmem>>, vector<1x128xf32>
    %55 = vector.broadcast %54 : vector<1x128xf32> to vector<32x128xf32>
    %56 = arith.addf %53, %55 : vector<32x128xf32>
    %cst_53 = arith.constant 0.000000e+00 : f32
    %57 = vector.broadcast %cst_53 : f32 to vector<32x128xf32>
    %58 = arith.maximumf %56, %57 : vector<32x128xf32>
    %59 = arith.truncf %58 : vector<32x128xf32> to vector<32x128xbf16>
    %c0_54 = arith.constant 0 : index
    %c0_55 = arith.constant 0 : index
    %60 = vector.load %arg4[%c0_54, %c0_55] : memref<16x128xbf16, #tpu.memory_space<vmem>>, vector<16x128xbf16>
    %cst_56 = arith.constant dense<0.000000e+00> : vector<16x32xf32>
    %61 = tpu.matmul %60, %59, %cst_56 {dimension_numbers = #tpu.dot_dimension_numbers<[1], [1], [0], [0], [0, 0, 1, 0], [], []>} : vector<16x128xbf16>, vector<32x128xbf16>, vector<16x32xf32> -> vector<16x32xf32>
    %c0_57 = arith.constant 0 : index
    %c0_58 = arith.constant 0 : index
    %62 = vector.load %arg5[%c0_57, %c0_58] : memref<16x1xf32, #tpu.memory_space<vmem>>, vector<16x1xf32>
    %63 = vector.broadcast %62 : vector<16x1xf32> to vector<16x32xf32>
    %64 = arith.addf %61, %63 : vector<16x32xf32>
    %c0_59 = arith.constant 0 : index
    %c0_60 = arith.constant 0 : index
    %c0_61 = arith.constant 0 : index
    %65 = vector.load %arg6[%c0_59, %c0_60, %c0_61] : memref<1x16x32xf32, #tpu.memory_space<vmem>>, vector<1x16x32xf32>
    %66 = vector.shape_cast %65 : vector<1x16x32xf32> to vector<16x32xf32>
    %67 = vector.shape_cast %64 : vector<16x32xf32> to vector<1x16x32xf32>
    tpu.vector_store %arg6[%c0_59, %c0_60, %c0_61], %67 {strides = array<i32>} : memref<1x16x32xf32, #tpu.memory_space<vmem>>, vector<1x16x32xf32>,
    return
  }
  func.func @transform_0(%arg0: i32) -> (i32, i32, i32) {
    %c0_i32 = arith.constant 0 : i32
    %c0_i32_0 = arith.constant 0 : i32
    %c0_i32_1 = arith.constant 0 : i32
    return %arg0, %c0_i32, %c0_i32_0 : i32, i32, i32
  }
  func.func @transform_1(%arg0: i32) -> (i32, i32, i32) {
    %c0_i32 = arith.constant 0 : i32
    %c0_i32_0 = arith.constant 0 : i32
    %c0_i32_1 = arith.constant 0 : i32
    %c0_i32_2 = arith.constant 0 : i32
    return %c0_i32, %c0_i32_0, %c0_i32_1 : i32, i32, i32
  }
  func.func @transform_2(%arg0: i32) -> (i32, i32) {
    %c0_i32 = arith.constant 0 : i32
    %c0_i32_0 = arith.constant 0 : i32
    %c0_i32_1 = arith.constant 0 : i32
    return %c0_i32, %c0_i32_0 : i32, i32
  }
  func.func @transform_3(%arg0: i32) -> (i32, i32) {
    %c0_i32 = arith.constant 0 : i32
    %c0_i32_0 = arith.constant 0 : i32
    %c0_i32_1 = arith.constant 0 : i32
    return %c0_i32, %c0_i32_0 : i32, i32
  }
  func.func @transform_4(%arg0: i32) -> (i32, i32) {
    %c0_i32 = arith.constant 0 : i32
    %c0_i32_0 = arith.constant 0 : i32
    %c0_i32_1 = arith.constant 0 : i32
    return %c0_i32, %c0_i32_0 : i32, i32
  }
  func.func @transform_5(%arg0: i32) -> (i32, i32, i32) {
    %c0_i32 = arith.constant 0 : i32
    %c0_i32_0 = arith.constant 0 : i32
    %c0_i32_1 = arith.constant 0 : i32
    return %arg0, %c0_i32, %c0_i32_0 : i32, i32, i32
  }
}

</mosaic_0001>

<bundles_post_ra>
// kernel: tpu_custom_call.1
= control target key start
LH: loop header
LB: loop body
LE: loop exit
PB: predicated region body
PF: predicated region fallthrough
CT: control target
= control target key end

     0   :  { %10 = vsyncpa [#allocation4], 0  ;;  %s1681_s0 = inlined_call_operand.hbm [shape: f32[4,16,32], index: 0, kind: input, shape index: {}]   ;;  %s1682_s1 = inlined_call_operand.hbm [shape: bf16[7,32,128], index: 1, kind: input, shape index: {}]   ;;  %s1683_s2 = inlined_call_operand.vmem [shape: f32[1,128], index: 2, kind: input, shape index: {}]   ;;  %s1684_s3 = inlined_call_operand.vmem [shape: bf16[16,128], index: 3, kind: input, shape index: {}]   ;;  %s1685_s4 = inlined_call_operand.vmem [shape: f32[16,1], index: 4, kind: input, shape index: {}]   ;;  %s1686_s5 = inlined_call_operand.hbm [shape: f32[2,16,32], index: 5, kind: output, shape index: {}]  }
   0x1   :  { %12 = vsyncpa [#allocation4 + $0x1], 0 }
   0x2   :  { %13 = vsyncpa [#allocation7], 0 }
   0x3   :  { %14 = vsyncpa [#allocation5], 0 }
   0x4   :  { %16 = vsyncpa [#allocation5 + $0x1], 0  ;;  %s1442_s18 = smov 0   ;;  %s1444_s19 = smov 0  }
   0x5   :  { %s1446_s20 = smov 0   ;;  %s1448_s21 = smov 0  }
   0x6 LB: > { %s1463_s22 = sadd.s32 4294967295, %s1398_s21   ;;  %s1019_s23 = sadd.s32 4294967294, %s1398_s21   ;;  %s1398_s21 = sphi %s1448_s21, %s1706_s21   ;;  %s1394_s20 = sphi %s1446_s20, %s1705_s20   ;;  %s1390_s19 = sphi %s1444_s19, %s1704_s19   ;;  %s1386_s18 = sphi %s1442_s18, %s1703_s18  }
   0x7   : > { %p42_p0 = scmp.ne.s32.totalorder %s1390_s19, %s1386_s18  ;;  %p1687_p1 = scmp.eq.s32.totalorder %s1463_s22, 0 }
   0x8   : > { %p156_p3 = scmp.eq.s32.totalorder %s1019_s23, 1  ;;  %p1020_p5 = scmp.ge.s32.totalorder %s1398_s21, 1 }
   0x9   : > { %p1472_p4 = por %p1687_p1, %p42_p0  ;;  %p163_p7 = scmp.lt.s32.totalorder %s1398_s21, 3 }
   0xa   : > { %p1477_p6 = por %p156_p3, %p42_p0  ;;  %s1400_s27 = smov [#allocation6]  }
   0xb   : > { %s1690_s24 = scalar_select %p1472_p4, 1, 0 }
   0xc   : > { %s1691_s25 = scalar_select %p1477_p6, 1, 0 }
   0xd   : > { %p1482_p8 = pnand %p1020_p5, %p163_p7  ;;  %s175_s28 = sshll.u32 %s1400_s27, 4  ;;  %s1486_s28 = int_to_ptr.vmem [resolvable:$true] %s175_s28 }
   0xe   : > { %s1498_s30 = sadd.s32 1, %s1398_s21   ;;  %s29_s6 = sadd.s32 1, %s1394_s20 }
   0xf   : > { %s1692_s26 = scalar_select %p1482_p8, 1, 0 }
  0x10   : > { %p1196_p9 = pneg %p1482_p8  ;;  %s26_s7 = ssub.s32 %s1398_s21, %s1498_s30 }
  0x11   : > { %s1270_s10 = scalar_lea.hbm %s1682_s1, 1792 }
  0x12   : > { %p1493_p11 = pnand %p1196_p9, %p1687_p1  ;;  %p1271_p12 = scmp.ne.s32.totalorder %s1682_s1, %s1270_s10 }
  0x13   : > { %p1277_p5 = scmp.lt.u32.totalorder %s1270_s10, %s1682_s1 }
  0x14   : > { %p1272_p13 = pneg %p1493_p11 }
  0x16   : > { %p1273_p0 = pnand %p1272_p13, %p1271_p12 }
  0x18   : > { %p1274_p3 = pneg %p1273_p0 }
  0x1a   : > { %p1279_p7 = pnand %p1277_p5, %p1274_p3 }
  0x1c   : > { %1282 = shalt.err (!%p1279_p7)
}
  0x1d   : > { %s1283_s15 = scalar_lea.vmem %s1486_s28, 1792  ;;  %p1291_p2 = scmp.lt.s32.totalorder %s1486_s28, %s1486_s28 }
  0x1e   : > { %p1284_p9 = scmp.ne.s32.totalorder %s1486_s28, %s1283_s15  ;;  %p1292_p6 = scmp.lt.s32.totalorder %s1283_s15, %s1283_s15 }
  0x20   : > { %p1286_p10 = pnand %p1284_p9, %p1272_p13  ;;  %p1293_p4 = por %p1292_p6, %p1291_p2 }
  0x22   : > { %p1287_p1 = pneg %p1286_p10 }
  0x24   : > { %p1294_p8 = pnand %p1293_p4, %p1287_p1 }
  0x26   : > { %1297 = shalt.err (!%p1294_p8)
}
  0x27   : > { %s1401_s16 = smov 64   ;;  %s1402_s17 = smov 4  }
  0x28   : > { %1199 = dma.hbm_to_vmem [thread:$0]  (!%p1493_p11), %s1682_s1, 1792, %s1486_s28, [#allocation7], %s1401_s16, %s1401_s16, %s1402_s17  }
  0x29   : > { %p27_p2 = scmp.eq.s32.totalorder %s26_s7, 0  ;;  %p36_p1 = scmp.ne.s32.totalorder %s1394_s20, %s1390_s19 }
  0x2a   : > { %p37_p4 = scmp.eq.s32.totalorder %s1398_s21, 0  ;;  %p1209_p6 = scmp.lt.s32.totalorder %s1398_s21, 2 }
  0x2b   : > { %s1529_s8 = scalar_select %p27_p2, %s1394_s20, %s29_s6  }
  0x2c   : > { %p38_p8 = por %p37_p4, %p36_p1  ;;  %p1694_p10 = scmp.eq.s32.totalorder %s1463_s22, 1 }
  0x2d   : > { %s198_s10 = sand.u32 1, %s1394_s20   ;;  %s1067_s11 = sshll.u32 %s1398_s21, 9 }
  0x2e   : > { %p1533_p12 = por %p1694_p10, %p36_p1  ;;  %s1023_s12 = sshll.u32 %s198_s10, 5 }
  0x2f   : > { %s1542_s14 = scalar_lea.hbm %s1681_s0, %s1067_s11  ;;  %s202_s28 = scalar_lea.vmem [#allocation3], %s1023_s12 }
  0x30   : > { %s210_s6 = sshll.u32 %s202_s28, 4  ;;  %p1544_p11 = pnand %p1209_p6, %p38_p8  ;;  %s1548_s6 = int_to_ptr.vmem [resolvable:$true] %s210_s6 }
  0x31   : > { %s1550_s15 = scalar_lea.sflag [#allocation4], %s198_s10  ;;  %s1298_s16 = scalar_lea.hbm %s1542_s14, 512 }
  0x32   : > { %p1299_p13 = scmp.ne.s32.totalorder %s1542_s14, %s1298_s16  ;;  %p1300_p0 = pneg %p1544_p11 }
  0x33   : > { %s1303_s27 = scalar_lea.hbm %s1681_s0, 1024  ;;  %p1304_p7 = scmp.lt.u32.totalorder %s1542_s14, %s1681_s0 }
  0x34   : > { %p1301_p3 = pnand %p1300_p0, %p1299_p13  ;;  %p1305_p9 = scmp.lt.u32.totalorder %s1303_s27, %s1298_s16 }
  0x35   : > { %p1307_p1 = scmp.lt.u32.totalorder %s1298_s16, %s1542_s14 }
  0x36   : > { %p1302_p5 = pneg %p1301_p3  ;;  %p1306_p2 = por %p1305_p9, %p1304_p7 }
  0x38   : > { %p1308_p4 = por %p1307_p1, %p1306_p2 }
  0x3a   : > { %p1309_p6 = pnand %p1308_p4, %p1302_p5 }
  0x3c   : > { %1312 = shalt.err (!%p1309_p6)
}
  0x3d   : > { %s1313_s10 = scalar_lea.vmem %s1548_s6, 512  ;;  %s1403_s29 = smov [#allocation3]  }
  0x3e   : > { %p1314_p8 = scmp.ne.s32.totalorder %s1548_s6, %s1313_s10  ;;  %s1318_s13 = sshll.u32 %s1403_s29, 4  ;;  %s1319_s13 = int_to_ptr.vmem [resolvable:$false] %s1318_s13 }
  0x3f   : > { %s1320_s28 = scalar_lea.vmem %s1319_s13, 1024  ;;  %p1321_p3 = scmp.lt.s32.totalorder %s1548_s6, %s1319_s13 }
  0x40   : > { %p1316_p10 = pnand %p1314_p8, %p1300_p0  ;;  %p1322_p7 = scmp.lt.s32.totalorder %s1320_s28, %s1313_s10 }
  0x42   : > { %p1317_p13 = pneg %p1316_p10  ;;  %p1323_p9 = por %p1322_p7, %p1321_p3 }
  0x44   : > { %p1324_p2 = pnand %p1323_p9, %p1317_p13 }
  0x46   : > { %1327 = shalt.err (!%p1324_p2)
}
  0x47   : > { %s1404_s16 = smov 128   ;;  %s1405_s17 = smov 8  }
  0x48   : > { %1203 = dma.hbm_to_vmem [thread:$0]  (!%p1544_p11), %s1542_s14, 512, %s1548_s6, %s1550_s15, %s1404_s16, %s1404_s16, %s1405_s17  }
  0x49   : > { %p1697_p0 = scmp.ne.s32.totalorder %s1692_s26, 0 }
  0x4a   : > { %s1581_s23 = sand.u32 (!%p1697_p0), 1, %s1390_s19   ;;  %p1698_p5 = scmp.ne.s32.totalorder (!%p1697_p0), %s1690_s24, 0 }
  0x4b   : > { %222 = sbr.rel (%p1697_p0) target bundleno = 620 (0x26c), region = 40  ;;  %s1028_s27 = sshll.u32 (!%p1697_p0), %s1581_s23, 5 }
  0x4c   : > { %s225_s11 = scalar_lea.sflag (!%p1697_p0), [#allocation4], %s1581_s23  ;;  %s228_s12 = scalar_lea.vmem (!%p1697_p0), [#allocation3], %s1028_s27 }
  0x52   : > { %1373 = dma.done.wait (%p1698_p5), %s225_s11, 512  }
  0x53   : > { %1375 = vsyncadd (%p1698_p5), %s225_s11, 4294966784  ;;  %p1699_p1 = scmp.eq.s32.totalorder %s1463_s22, 0 }
  0x55   : > { %1377 = dma.done.wait (%p1699_p1), [#allocation7], 1792   ;;  %p1700_p11 = pmov %p1699_p1 }
  0x56   : > { %vm274_vm0 = vcmask 259072   ;;  %v1406_v0 = vmov 0.0   ;;  %v1255_v1 = vld [vmem:[#allocation6 + $0x20] sm:$0xff]   ;;  %v1256_v2 = vld [vmem:[#allocation6 + $0x28] sm:$0xff]   ;;  %vm269_vm1 = vcmask 261120   ;;  %v1257_v7 = vld [vmem:[#allocation6 + $0x30] sm:$0xff]  }
  0x57   : > { %1379 = vsyncadd (%p1700_p11), [#allocation7], 4294965504  ;;  %275 = vst.msk [vmem:[#allocation2 + $0x10] sm:$0x3f] %vm274_vm0, %v1406_v0  ;;  %1116 = vmatprep.subr.bf16.mxu0 %v1255_v1  ;;  %v261_v3 = vld [vmem:[%s228_s12] sm:$0xff]  ;;  %v262_v4 = vld [vmem:[%s228_s12 + $0x8] sm:$0xff] }
  0x58   : > { %276 = vst.msk [vmem:[#allocation2 + $0x28] sm:$0x3f] %vm274_vm0, %v1406_v0  ;;  %1117 = vmatpush3.bf16.msra.mxu0 %v1255_v1  ;;  %v265_v5 = vmax.f32 %v261_v3, 0.0  ;;  %v266_v6 = vmax.f32 %v262_v4, 0.0  ;;  %v263_v8 = vld [vmem:[%s228_s12 + $0x10] sm:$0xff]  ;;  %v264_v9 = vld [vmem:[%s228_s12 + $0x18] sm:$0xff] }
  0x59   : > { %1118 = vmatprep.subr.bf16.mxu0 %v1256_v2  ;;  %v267_v10 = vmax.f32 %v263_v8, 0.0  ;;  %v268_v11 = vmax.f32 %v264_v9, 0.0  ;;  %v1260_v12 = vld [vmem:[#allocation6 + $0x10] sm:$0xff]   ;;  %v1261_v13 = vld [vmem:[#allocation6 + $0x18] sm:$0xff]   ;;  %v1264_v14 = vld [vmem:[#allocation6] sm:$0xff]   ;;  %vm1407_vm2 = vmmov 0  }
  0x5a   : > { %270 = vst.msk [vmem:[#allocation2] sm:$0xff] %vm269_vm1, %v265_v5  ;;  %271 = vst.msk [vmem:[#allocation2 + $0x8] sm:$0xff] %vm269_vm1, %v266_v6  ;;  %1100 = vmatprep.subr.bf16.mxu1 %v1260_v12  ;;  %v1258_v27 = vld [vmem:[#allocation6 + $0x38] sm:$0xff]   ;;  %v1265_v31 = vld [vmem:[#allocation6 + $0x8] sm:$0xff]   ;;  %v1408_v3 = vmov 0   ;;  %s1030_s13 = sshll.u32 %s1581_s23, 4 }
  0x5b   : > { %272 = vst.msk [vmem:[#allocation2 + $0x18] sm:$0xff] %vm269_vm1, %v267_v10  ;;  %273 = vst.msk [vmem:[#allocation2 + $0x20] sm:$0xff] %vm269_vm1, %v268_v11  ;;  %1101 = vmatpush3.bf16.msra.mxu1 %v1260_v12  ;;  %v1259_v33 = vld [vmem:[#allocation6 + $0x40] sm:$0xff]   ;;  %v1262_v44 = vld [vmem:[#allocation6 + $0x48] sm:$0xff]   ;;  %1254 = vset.pattern.permute.xlu0 %v1408_v3  ;;  %s258_s28 = scalar_lea.vmem [#allocation8], %s1030_s13  ;;  %s1068_s17 = sshll.u32 %s1463_s22, 8 }
  0x5c   : > { %1119 = vmatpush3.bf16.msra.mxu0 %v1256_v2  ;;  %1102 = vmatprep.subr.bf16.mxu1 %v1261_v13  ;;  %v1263_v46 = vld [vmem:[#allocation6 + $0x50] sm:$0xff]   ;;  %v1266_v53 = vld [vmem:[#allocation6 + $0x58] sm:$0xff]   ;;  %v1267_v54 = vld [vmem:[#allocation6 + $0x60] sm:$0xff]   ;;  %s936_s16 = sshll.u32 %s258_s28, 4  ;;  %s1635_s12 = scalar_lea.hbm %s1686_s5, %s1068_s17  ;;  %s1630_s16 = int_to_ptr.vmem [resolvable:$true] %s936_s16 }
  0x5d   : > { %1124 = vmatprep.subr.bf16.mxu0 %v1257_v7  ;;  %v1268_v61 = vld [vmem:[#allocation6 + $0x68] sm:$0xff]   ;;  %v861_v2 = vld [vmem:[%s1685_s4] sm:$0xff]  ;;  %v862_v4 = vld [vmem:[%s1685_s4 + $0x8] sm:$0xff]  ;;  %s923_s22 = scalar_lea.sflag [#allocation5], %s1581_s23  ;;  %s1328_s24 = scalar_lea.vmem %s1630_s16, 256 }
  0x5e   : > { %865 = vperm.xlu0 %1254, %v861_v2   ;;  %v1059_v10 = vld [vmem:[%s1683_s2] ss:$0 sm:$0xff]  ;;  %p1329_p4 = scmp.ne.s32.totalorder %s1630_s16, %s1328_s24  ;;  %s1409_s26 = smov [#allocation8]  }
  0x5f   : > { %1103 = vmatpush3.bf16.msra.mxu1 %v1261_v13  ;;  %s1332_s14 = sshll.u32 %s1409_s26, 4  ;;  %s1333_s14 = int_to_ptr.vmem [resolvable:$false] %s1332_s14 }
  0x60   : > { %1108 = vmatprep.subr.bf16.mxu1 %v1264_v14  ;;  %p1330_p6 = pnand %p1329_p4, %p1533_p12  ;;  %s1334_s6 = scalar_lea.vmem %s1333_s14, 512 }
  0x61   : > { %v432_v15 = vld [vmem:[#allocation2 + $0x2] sm:$0xff]  ;;  %v433_v16 = vld [vmem:[#allocation2 + $0xa] sm:$0xff]  ;;  %p1335_p10 = scmp.lt.s32.totalorder %s1630_s16, %s1333_s14  ;;  %p1336_p13 = scmp.lt.s32.totalorder %s1334_s6, %s1328_s24 }
  0x62   : > { %v514_v17 = vld [vmem:[#allocation2 + $0x3] sm:$0xff]  ;;  %v436_v18 = vpack.c.bf16 %v433_v16, %v432_v15  ;;  %v515_v19 = vld [vmem:[#allocation2 + $0xb] sm:$0xff]  ;;  %v434_v22 = vld [vmem:[#allocation2 + $0x1a] sm:$0xff]  ;;  %870 = vperm.xlu0 %1254, %v862_v4   ;;  %p1331_p8 = pneg %p1330_p6 }
  0x63   : > { %v287_v20 = vld [vmem:[#allocation2 + $0x1] sm:$0xff]  ;;  %v288_v21 = vld [vmem:[#allocation2 + $0x9] sm:$0xff]  ;;  %v518_v24 = vpack.c.bf16 %v515_v19, %v514_v17  ;;  %v289_v28 = vld [vmem:[#allocation2 + $0x19] sm:$0xff]  ;;  %p1337_p3 = por %p1336_p13, %p1335_p10 }
  0x64   : > { %v435_v23 = vld [vmem:[#allocation2 + $0x22] sm:$0xff]  ;;  %v291_v25 = vpack.c.bf16 %v288_v21, %v287_v20  ;;  %1120 = vmatprep.mubr.msk.bf16.mxu0 %vm269_vm1, %v436_v18  ;;  %v597_v39 = vld [vmem:[#allocation2 + $0xc] sm:$0xff]  ;;  %v279_v40 = vld [vmem:[#allocation2 + $0x18] sm:$0xff] }
  0x65   : > { %v437_v26 = vpack.c.bf16 %v435_v23, %v434_v22  ;;  %v290_v29 = vld [vmem:[#allocation2 + $0x21] sm:$0xff]  ;;  %v679_v50 = vld [vmem:[#allocation2 + $0xd] sm:$0xff]  ;;  %p1338_p7 = pnand %p1337_p3, %p1331_p8 }
  0x66   : > { %1104 = vmatprep.mubr.msk.bf16.mxu1 %vm269_vm1, %v291_v25  ;;  %v292_v30 = vpack.c.bf16 %v290_v29, %v289_v28  ;;  %v277_v32 = vld [vmem:[#allocation2] sm:$0xff]  ;;  %v278_v34 = vld [vmem:[#allocation2 + $0x8] sm:$0xff] }
  0x67   : > { %1121 = vmatmul.mubr.msk.bf16.vlgmr.msra.gmra.mrb[0].mxu0 %vm269_vm1, %v437_v26  ;;  %v281_v35 = vpack.c.bf16 %v278_v34, %v277_v32  ;;  %v516_v36 = vld [vmem:[#allocation2 + $0x1b] sm:$0xff]  ;;  %v517_v37 = vld [vmem:[#allocation2 + $0x23] sm:$0xff]  ;;  %v761_v58 = vld [vmem:[#allocation2 + $0xe] sm:$0xff] }
  0x68   : > { %1125 = vmatpush3.bf16.msra.mxu0 %v1257_v7  ;;  %1128 = vmatprep.mubr.msk.bf16.mxu0 %vm269_vm1, %v518_v24  ;;  %v596_v38 = vld [vmem:[#allocation2 + $0x4] sm:$0xff]  ;;  %v519_v42 = vpack.c.bf16 %v517_v37, %v516_v36  ;;  %v598_v47 = vld [vmem:[#allocation2 + $0x1c] sm:$0xff] }
  0x69   : > { %1126 = vmatprep.subr.bf16.mxu0 %v1258_v27  ;;  %1105 = vmatmul.mubr.msk.bf16.vlgmr.msra.gmra.mrb[0].mxu1 %vm269_vm1, %v292_v30  ;;  %v280_v41 = vld [vmem:[#allocation2 + $0x20] sm:$0xff]  ;;  %v600_v43 = vpack.c.bf16 %v597_v39, %v596_v38 }
  0x6a   : > { %1109 = vmatpush3.bf16.msra.mxu1 %v1264_v14  ;;  %1112 = vmatprep.mubr.msk.bf16.mxu1 %vm269_vm1, %v281_v35  ;;  %v282_v45 = vpack.c.bf16 %v280_v41, %v279_v40  ;;  %v599_v48 = vld [vmem:[#allocation2 + $0x24] sm:$0xff] }
  0x6b   : > { %1110 = vmatprep.subr.bf16.mxu1 %v1265_v31  ;;  %v678_v49 = vld [vmem:[#allocation2 + $0x5] sm:$0xff]  ;;  %v601_v51 = vpack.c.bf16 %v599_v48, %v598_v47  ;;  %v680_v55 = vld [vmem:[#allocation2 + $0x1d] sm:$0xff] }
  0x6c   : > { %1127 = vmatpush3.bf16.msra.mxu0 %v1258_v27  ;;  %v682_v52 = vpack.c.bf16 %v679_v50, %v678_v49  ;;  %v681_v56 = vld [vmem:[#allocation2 + $0x25] sm:$0xff] }
  0x6d   : > { %1132 = vmatprep.subr.bf16.mxu0 %v1259_v33  ;;  %v760_v57 = vld [vmem:[#allocation2 + $0x6] sm:$0xff]  ;;  %v683_v59 = vpack.c.bf16 %v681_v56, %v680_v55  ;;  %v762_v62 = vld [vmem:[#allocation2 + $0x1e] sm:$0xff] }
  0x6e   : > { %1111 = vmatpush3.bf16.msra.mxu1 %v1265_v31  ;;  %v764_v60 = vpack.c.bf16 %v761_v58, %v760_v57  ;;  %v763_v63 = vld [vmem:[#allocation2 + $0x26] sm:$0xff] }
  0x6f   : > { %1156 = vmatprep.subr.bf16.mxu1 %v1406_v0  ;;  %v765_v1 = vpack.c.bf16 %v763_v63, %v762_v62  ;;  %v1269_v28 = vld [vmem:[%s1684_s3] sm:$0xff]  }
  0x73   : > { %1129 = vmatmul.mubr.msk.bf16.vlgmr.msra.gmra.mrb[0].mxu0 %vm269_vm1, %v519_v42 }
  0x74   : > { %1133 = vmatpush3.bf16.msra.mxu0 %v1259_v33  ;;  %1136 = vmatprep.mubr.msk.bf16.mxu0 %vm269_vm1, %v600_v43 }
  0x75   : > { %1134 = vmatprep.subr.bf16.mxu0 %v1262_v44  ;;  %1113 = vmatmul.mubr.msk.bf16.vlgmr.msra.gmra.mrb[0].mxu1 %vm269_vm1, %v282_v45 }
  0x76   : > { %1160 = vmatprep.mubr.msk.bf16.mxu1 %vm1407_vm2, %v1406_v0 }
  0x78   : > { %1135 = vmatpush3.bf16.msra.mxu0 %v1262_v44 }
  0x79   : > { %1140 = vmatprep.subr.bf16.mxu0 %v1263_v46 }
  0x7f   : > { %1137 = vmatmul.mubr.msk.bf16.vlgmr.msra.gmra.mrb[0].mxu0 %vm269_vm1, %v601_v51 }
  0x80   : > { %1141 = vmatpush3.bf16.msra.mxu0 %v1263_v46  ;;  %1144 = vmatprep.mubr.msk.bf16.mxu0 %vm269_vm1, %v682_v52 }
  0x81   : > { %1142 = vmatprep.subr.bf16.mxu0 %v1266_v53 }
  0x84   : > { %1143 = vmatpush3.bf16.msra.mxu0 %v1266_v53 }
  0x85   : > { %1148 = vmatprep.subr.bf16.mxu0 %v1267_v54 }
  0x8b   : > { %1145 = vmatmul.mubr.msk.bf16.vlgmr.msra.gmra.mrb[0].mxu0 %vm269_vm1, %v683_v59 }
  0x8c   : > { %1149 = vmatpush3.bf16.msra.mxu0 %v1267_v54  ;;  %1152 = vmatprep.mubr.msk.bf16.mxu0 %vm269_vm1, %v764_v60 }
  0x8d   : > { %1150 = vmatprep.subr.bf16.mxu0 %v1268_v61 }
  0x90   : > { %1151 = vmatpush3.bf16.msra.mxu0 %v1268_v61 }
  0x97   : > { %1153 = vmatmul.mubr.msk.bf16.vlgmr.msra.gmra.mrb[0].mxu0 %vm269_vm1, %v765_v1 }
  0xdd   : > { %v866_v29 = vpop.permute.xlu0 %865 }
  0xe1   : > { %v871_v32 = vpop.permute.xlu0 %870 }
 0x148   : > { %v1114_v5 = vpop.f32.mrb[0].mxu1 }
 0x149   : > { %v417_v6 = vpop.f32.mrb[1].mxu1 }
 0x14a   : > { %v1115_v7 = vpop.f32.mrb[2].mxu1 }
 0x14b   : > { %v420_v8 = vpop.f32.mrb[3].mxu1 }
 0x16a   : > { %v1154_v9 = vpop.f32.mrb[0].mxu0 }
 0x16b   : > { %v1164_v11 = vadd.f32 %v1154_v9, %v1114_v5  ;;  %v823_v12 = vpop.f32.mrb[1].mxu0 }
 0x16c   : > { %v1165_v13 = vadd.f32 %v823_v12, %v417_v6  ;;  %v1155_v14 = vpop.f32.mrb[2].mxu0 }
 0x16d   : > { %v851_v15 = vadd.f32 %v1164_v11, %v1059_v10  ;;  %v1166_v16 = vadd.f32 %v1155_v14, %v1115_v7  ;;  %v826_v17 = vpop.f32.mrb[3].mxu0 }
 0x16e   : > { %v849_v18 = vadd.f32 %v1165_v13, %v1059_v10  ;;  %v1167_v19 = vadd.f32 %v826_v17, %v420_v8 }
 0x16f   : > { %v852_v20 = vadd.f32 %v1166_v16, %v1059_v10  ;;  %v855_v22 = vmax.f32 %v851_v15, 0.0 }
 0x170   : > { %v850_v21 = vadd.f32 %v1167_v19, %v1059_v10  ;;  %v853_v24 = vmax.f32 %v849_v18, 0.0 }
 0x171   : > { %v856_v23 = vmax.f32 %v852_v20, 0.0 }
 0x172   : > { %v854_v25 = vmax.f32 %v850_v21, 0.0 }
 0x173   : > { %v858_v26 = vpack.c.bf16 %v856_v23, %v855_v22 }
 0x174   : > { %v857_v27 = vpack.c.bf16 %v854_v25, %v853_v24 }
 0x176   : > { %1157 = vmatpush3.bf16.xpose.msra.mxu1 %v857_v27 }
 0x177   : > { %1158 = vmatprep.subr.bf16.mxu1 %v1406_v0 }
 0x17e   : > { %1159 = vmatpush3.bf16.xpose.msra.mxu1 %v858_v26 }
 0x185   : > { %1161 = vmatmul.mubr.bf16.vlgmr.msra.gmra.mrb[4].mxu1 %v1269_v28 }
 0x258   : > { %v913_v30 = vpop.f32.mrb[4].mxu1 }
 0x259   : > { %v914_v31 = vadd.f32 %v913_v30, %v866_v29  ;;  %v1162_v0 = vpop.f32.mrb[5].mxu1 }
 0x25a   : > { %v916_v33 = vpop.f32.mrb[6].mxu1 }
 0x25b   : > { %920 = vst.msk [vmem:[%s258_s28] sm:$0xff] %vm269_vm1, %v914_v31  ;;  %v917_v34 = vadd.f32 %v916_v33, %v871_v32  ;;  %v1163_v35 = vpop.f32.mrb[7].mxu1 }
 0x25d   : > { %921 = vst.msk [vmem:[%s258_s28 + $0x8] sm:$0xff] %vm269_vm1, %v917_v34 }
 0x25e   : > { %1341 = shalt.err (!%p1338_p7)
}
 0x25f   : > { %s1342_s7 = scalar_lea.hbm %s1635_s12, 256  ;;  %s1346_s29 = scalar_lea.hbm %s1686_s5, 512 }
 0x260   : > { %p1343_p9 = scmp.ne.s32.totalorder %s1635_s12, %s1342_s7  ;;  %p1347_p5 = scmp.lt.u32.totalorder %s1635_s12, %s1686_s5 }
 0x261   : > { %p1348_p1 = scmp.lt.u32.totalorder %s1346_s29, %s1342_s7  ;;  %p1350_p4 = scmp.lt.u32.totalorder %s1342_s7, %s1635_s12 }
 0x262   : > { %p1344_p2 = pnand %p1343_p9, %p1533_p12 }
 0x263   : > { %p1349_p11 = por %p1348_p1, %p1347_p5 }
 0x264   : > { %p1345_p0 = pneg %p1344_p2 }
 0x265   : > { %p1351_p6 = por %p1350_p4, %p1349_p11 }
 0x267   : > { %p1352_p8 = pnand %p1351_p6, %p1345_p0 }
 0x269   : > { %1355 = shalt.err (!%p1352_p8)
}
 0x26a   : > { %s1410_s17 = smov 128   ;;  %s1411_s27 = smov 8  }
 0x26b   : > { %1194 = dma.vmem_to_hbm [thread:$0]  (%p1533_p12), %s1630_s16, 256, %s1635_s12, %s923_s22, %s1410_s17, %s1410_s17, %s1411_s27  }
 0x26c PF: > { %s951_s11 = sand.u32 1, %s1386_s18   ;;  %p1701_p10 = scmp.ne.s32.totalorder %s1691_s25, 0 }
 0x26d   : > { %p1702_p13 = scmp.ge.s32.totalorder %s1398_s21, 2  ;;  %s952_s24 = scalar_lea.sflag [#allocation5], %s951_s11 }
 0x26f   : > { %p1205_p3 = pnand %p1702_p13, %p1701_p10 }
 0x271   : > { %1381 = dma.done.wait (!%p1205_p3), %s952_s24, 256  }
 0x272   : > { %1383 = vsyncadd (!%p1205_p3), %s952_s24, 4294967040  ;;  %p19_p7 = scmp.ge.s32.totalorder %s1498_s30, 4   ;;  %s1703_s18 = smov %s1390_s19 }
 0x273   : > { %s1704_s19 = smov %s1394_s20  ;;  %s1705_s20 = smov %s1529_s8 }
 0x274   : > { %s1706_s21 = smov %s1498_s30  ;;  %21 = sbr.rel (!%p19_p7) target bundleno = 6 (0x6), region = 95 }
 0x27b   :  { %957 = vsyncpa [#allocation4], 1 }
 0x27c   :  { %959 = vsyncpa [#allocation4 + $0x1], 1 }
 0x27d   :  { %960 = vsyncpa [#allocation7], 1 }
 0x27e   :  { %961 = vsyncpa [#allocation5], 1 }
 0x27f   :  { %963 = vsyncpa [#allocation5 + $0x1], 1 }

</bundles_post_ra>
